<compile_context>
chip_gen: v7x
topology: tpu7x:2x2x1
jax: 0.10.0
libtpu: 0.0.40
codegen_flags: <defaults>
</compile_context>

<pallas_src>
import math

import jax
import jax.numpy as jnp
from jax.experimental import pallas as pl
from jax.experimental.pallas import tpu as pltpu


def _round_up(a, b):
    return (a + b - 1) // b * b


def _minivae_kernel(x_ref, stdz_ref, w_ref, b_ref, z_ref, mu_ref, ls_ref):
    """One (TM, CP) lane-packed row tile.

    x_ref    : (TM, CP)       packed input rows           (VMEM, tiled)
    stdz_ref : (TM, CP)       packed std normal noise     (VMEM, tiled)
    w_ref    : (CP, 2*CP)     [blockdiag(W_mu^T) | blockdiag(W_ls^T)] (resident)
    b_ref    : (1, 2*CP)      [tiled b_mu | tiled b_ls]   (resident)
    outputs  : z, mu, log_sigma2 — each (TM, CP), packed like x.
    """
    cp = mu_ref.shape[-1]
    x = x_ref[...]
    # Single MXU matmul computes both linears, f32 accumulation.
    h = jnp.dot(x, w_ref[...], preferred_element_type=jnp.float32)
    h = h + b_ref[...].astype(jnp.float32)
    # cp is a multiple of 128, so these lane slices stay vreg-aligned (no copy).
    mu = h[:, :cp]
    ls = h[:, cp:]
    sigma = jnp.exp(0.5 * ls)                       # EUP transcendental (free slot)
    z = mu + sigma * stdz_ref[...].astype(jnp.float32)
    z_ref[...] = z.astype(z_ref.dtype)
    mu_ref[...] = mu.astype(mu_ref.dtype)
    ls_ref[...] = ls.astype(ls_ref.dtype)


def minivae_forward(x, w_mu, b_mu, w_ls, b_ls, std_z, *, tm_target=1024):
    """x, std_z: (..., C). w_*: (C, C) as nn.Linear stores them (out, in). b_*: (C,).

    Returns (z, mu, log_sigma2), each shaped like x.
    """
    # TODO(synk): the `std_z is None -> randn_like` branch of the PyTorch module is
    # handled by the caller sampling std_z with jax.random (not inside the kernel).
    orig_shape = x.shape
    C = orig_shape[-1]
    M = int(math.prod(orig_shape[:-1]))
    x2d = x.reshape(M, C)
    s2d = std_z.reshape(M, C)

    # Lane packing factor: fill the 128-lane vreg when C divides 128.
    pack = 128 // C if (C < 128 and 128 % C == 0) else 1
    CP = pack * C

    # Packed weights: block-diagonal so each C-lane group gets its own W^T,
    # with mu and log_sigma2 weights concatenated along the output dim.
    wt_mu_big = jax.scipy.linalg.block_diag(*([w_mu.T] * pack))
    wt_ls_big = jax.scipy.linalg.block_diag(*([w_ls.T] * pack))
    w_big = jnp.concatenate([wt_mu_big, wt_ls_big], axis=1)         # (CP, 2*CP)
    b_big = jnp.concatenate(
        [jnp.tile(b_mu, pack), jnp.tile(b_ls, pack)]).reshape(1, 2 * CP)

    # Tile over packed rows (double-buffered pipeline over the M axis).
    Mp = -(-M // pack)                                  # ceil(M / pack)
    TM = min(tm_target, _round_up(max(Mp, 1), 8))       # multiple of 8 sublanes
    Mp_pad = _round_up(Mp, TM)
    M_pad = Mp_pad * pack

    pad = ((0, M_pad - M), (0, 0))
    xp = jnp.pad(x2d, pad).reshape(Mp_pad, CP)
    sp = jnp.pad(s2d, pad).reshape(Mp_pad, CP)

    row_spec = pl.BlockSpec((TM, CP), lambda i: (i, 0))
    out_sds = jax.ShapeDtypeStruct((Mp_pad, CP), x.dtype)

    itemsize = jnp.dtype(x.dtype).itemsize
    cost = pl.CostEstimate(
        flops=2 * M * C * (2 * C),
        transcendentals=M * C,
        bytes_accessed=(5 * M * C + 2 * C * C + 2 * C) * itemsize,
    )

    z_p, mu_p, ls_p = pl.pallas_call(
        _minivae_kernel,
        out_shape=(out_sds, out_sds, out_sds),
        grid_spec=pltpu.PrefetchScalarGridSpec(
            num_scalar_prefetch=0,
            grid=(Mp_pad // TM,),
            in_specs=[
                row_spec,                                       # x rows (tiled)
                row_spec,                                       # std_z rows (tiled)
                pl.BlockSpec((CP, 2 * CP), lambda i: (0, 0)),   # packed W (resident)
                pl.BlockSpec((1, 2 * CP), lambda i: (0, 0)),    # packed bias (resident)
            ],
            out_specs=[row_spec, row_spec, row_spec],
        ),
        compiler_params=pltpu.CompilerParams(
            dimension_semantics=("parallel",),
        ),
        cost_estimate=cost,
    )(xp, sp, w_big, b_big)

    def _unpack(a):
        return a.reshape(M_pad, C)[:M].reshape(orig_shape)

    return _unpack(z_p), _unpack(mu_p), _unpack(ls_p)


if __name__ == "__main__":
    key = jax.random.PRNGKey(0)
    B, N, C = 2, 8, 32   # mid_ch = 32

    k_x, k_wm, k_bm, k_wl, k_bl, k_z = jax.random.split(key, 6)
    x = jax.random.normal(k_x, (B, N, C), dtype=jnp.float32)
    std_z = jax.random.normal(k_z, (B, N, C), dtype=jnp.float32)

    # Deterministic nn.Linear-style init: U(-1/sqrt(in_ch), 1/sqrt(in_ch)).
    bound = 1.0 / math.sqrt(C)
    w_mu = jax.random.uniform(k_wm, (C, C), minval=-bound, maxval=bound,
                              dtype=jnp.float32)     # (out_ch, in_ch)
    b_mu = jax.random.uniform(k_bm, (C,), minval=-bound, maxval=bound,
                              dtype=jnp.float32)
    w_ls = jax.random.uniform(k_wl, (C, C), minval=-bound, maxval=bound,
                              dtype=jnp.float32)
    b_ls = jax.random.uniform(k_bl, (C,), minval=-bound, maxval=bound,
                              dtype=jnp.float32)

    z, mu, ls = minivae_forward(x, w_mu, b_mu, w_ls, b_ls, std_z)
    z, mu, ls = jax.block_until_ready((z, mu, ls))

    # Pure-JAX reference of the PyTorch forward.
    mu_ref = jnp.einsum("bnc,oc->bno", x, w_mu) + b_mu
    ls_ref = jnp.einsum("bnc,oc->bno", x, w_ls) + b_ls
    z_ref = mu_ref + jnp.exp(0.5 * ls_ref) * std_z

    assert z.shape == (B, N, C) and mu.shape == (B, N, C) and ls.shape == (B, N, C)
    assert jnp.allclose(mu, mu_ref, atol=1e-4, rtol=1e-4), "mu mismatch vs reference"
    assert jnp.allclose(ls, ls_ref, atol=1e-4, rtol=1e-4), "log_sigma2 mismatch vs reference"
    assert jnp.allclose(z, z_ref, atol=1e-4, rtol=1e-4), "z mismatch vs reference"

    print("KERNEL_OK")
</pallas_src>

<mosaic_0001>
module attributes {stable_mosaic.version = 11 : i64} {
  func.func @_minivae_kernel(%arg0: i32, %arg1: memref<8x128xf32, #tpu.memory_space<vmem>>, %arg2: memref<8x128xf32, #tpu.memory_space<vmem>>, %arg3: memref<128x256xf32, #tpu.memory_space<vmem>>, %arg4: memref<1x256xf32, #tpu.memory_space<vmem>>, %arg5: memref<8x128xf32, #tpu.memory_space<vmem>>, %arg6: memref<8x128xf32, #tpu.memory_space<vmem>>, %arg7: memref<8x128xf32, #tpu.memory_space<vmem>>) attributes {dimension_semantics = [#tpu.dimension_semantics<parallel>], iteration_bounds = array<i64: 1>, scalar_prefetch = 0 : i64, scratch_operands = 0 : i64, tpu.core_type = #tpu.core_type<tc>, window_params = [{transform_indices = @transform_0, window_bounds = array<i64: 8, 128>}, {transform_indices = @transform_1, window_bounds = array<i64: 8, 128>}, {pipeline_mode = #tpu.pipeline_mode<synchronous>, transform_indices = @transform_2, window_bounds = array<i64: 128, 256>}, {pipeline_mode = #tpu.pipeline_mode<synchronous>, transform_indices = @transform_3, window_bounds = array<i64: 1, 256>}, {transform_indices = @transform_4, window_bounds = array<i64: 8, 128>}, {transform_indices = @transform_5, window_bounds = array<i64: 8, 128>}, {transform_indices = @transform_6, window_bounds = array<i64: 8, 128>}]} {
    %c0 = arith.constant 0 : index
    %c0_0 = arith.constant 0 : index
    %0 = vector.load %arg1[%c0, %c0_0] : memref<8x128xf32, #tpu.memory_space<vmem>>, vector<8x128xf32>
    %c0_1 = arith.constant 0 : index
    %c0_2 = arith.constant 0 : index
    %1 = vector.load %arg3[%c0_1, %c0_2] : memref<128x256xf32, #tpu.memory_space<vmem>>, vector<128x256xf32>
    %cst = arith.constant dense<0.000000e+00> : vector<8x256xf32>
    %2 = tpu.matmul %0, %1, %cst {dimension_numbers = #tpu.dot_dimension_numbers<[1], [0], [0], [1], [0, 0, 1, 1], [], []>} : vector<8x128xf32>, vector<128x256xf32>, vector<8x256xf32> -> vector<8x256xf32>
    %c0_3 = arith.constant 0 : index
    %c0_4 = arith.constant 0 : index
    %3 = vector.load %arg4[%c0_3, %c0_4] : memref<1x256xf32, #tpu.memory_space<vmem>>, vector<1x256xf32>
    %4 = vector.broadcast %3 : vector<1x256xf32> to vector<8x256xf32>
    %5 = arith.addf %2, %4 : vector<8x256xf32>
    %6 = vector.extract_strided_slice %5 {offsets = [0, 0], sizes = [8, 128], strides = [1, 1]} : vector<8x256xf32> to vector<8x128xf32>
    %7 = vector.extract_strided_slice %5 {offsets = [0, 128], sizes = [8, 128], strides = [1, 1]} : vector<8x256xf32> to vector<8x128xf32>
    %cst_5 = arith.constant 5.000000e-01 : f32
    %8 = vector.broadcast %cst_5 : f32 to vector<8x128xf32>
    %9 = arith.mulf %8, %7 : vector<8x128xf32>
    %10 = math.exp %9 : vector<8x128xf32>
    %c0_6 = arith.constant 0 : index
    %c0_7 = arith.constant 0 : index
    %11 = vector.load %arg2[%c0_6, %c0_7] : memref<8x128xf32, #tpu.memory_space<vmem>>, vector<8x128xf32>
    %12 = arith.mulf %10, %11 : vector<8x128xf32>
    %13 = arith.addf %6, %12 : vector<8x128xf32>
    %c0_8 = arith.constant 0 : index
    %c0_9 = arith.constant 0 : index
    %14 = vector.load %arg5[%c0_8, %c0_9] : memref<8x128xf32, #tpu.memory_space<vmem>>, vector<8x128xf32>
    tpu.vector_store %arg5[%c0_8, %c0_9], %13 {strides = array<i32>} : memref<8x128xf32, #tpu.memory_space<vmem>>, vector<8x128xf32>,
    %c0_10 = arith.constant 0 : index
    %c0_11 = arith.constant 0 : index
    %15 = vector.load %arg6[%c0_10, %c0_11] : memref<8x128xf32, #tpu.memory_space<vmem>>, vector<8x128xf32>
    tpu.vector_store %arg6[%c0_10, %c0_11], %6 {strides = array<i32>} : memref<8x128xf32, #tpu.memory_space<vmem>>, vector<8x128xf32>,
    %c0_12 = arith.constant 0 : index
    %c0_13 = arith.constant 0 : index
    %16 = vector.load %arg7[%c0_12, %c0_13] : memref<8x128xf32, #tpu.memory_space<vmem>>, vector<8x128xf32>
    tpu.vector_store %arg7[%c0_12, %c0_13], %7 {strides = array<i32>} : memref<8x128xf32, #tpu.memory_space<vmem>>, vector<8x128xf32>,
    return
  }
  func.func @transform_0(%arg0: i32) -> (i32, i32) {
    %c0_i32 = arith.constant 0 : i32
    %c0_i32_0 = arith.constant 0 : i32
    return %arg0, %c0_i32 : i32, i32
  }
  func.func @transform_1(%arg0: i32) -> (i32, i32) {
    %c0_i32 = arith.constant 0 : i32
    %c0_i32_0 = arith.constant 0 : i32
    return %arg0, %c0_i32 : i32, i32
  }
  func.func @transform_2(%arg0: i32) -> (i32, i32) {
    %c0_i32 = arith.constant 0 : i32
    %c0_i32_0 = arith.constant 0 : i32
    %c0_i32_1 = arith.constant 0 : i32
    return %c0_i32, %c0_i32_0 : i32, i32
  }
  func.func @transform_3(%arg0: i32) -> (i32, i32) {
    %c0_i32 = arith.constant 0 : i32
    %c0_i32_0 = arith.constant 0 : i32
    %c0_i32_1 = arith.constant 0 : i32
    return %c0_i32, %c0_i32_0 : i32, i32
  }
  func.func @transform_4(%arg0: i32) -> (i32, i32) {
    %c0_i32 = arith.constant 0 : i32
    %c0_i32_0 = arith.constant 0 : i32
    return %arg0, %c0_i32 : i32, i32
  }
  func.func @transform_5(%arg0: i32) -> (i32, i32) {
    %c0_i32 = arith.constant 0 : i32
    %c0_i32_0 = arith.constant 0 : i32
    return %arg0, %c0_i32 : i32, i32
  }
  func.func @transform_6(%arg0: i32) -> (i32, i32) {
    %c0_i32 = arith.constant 0 : i32
    %c0_i32_0 = arith.constant 0 : i32
    return %arg0, %c0_i32 : i32, i32
  }
}

</mosaic_0001>

<bundles_post_ra>
// kernel: tpu_custom_call.1
= control target key start
LH: loop header
LB: loop body
LE: loop exit
PB: predicated region body
PF: predicated region fallthrough
CT: control target
= control target key end

     0   :  { %12 = vsyncpa [#allocation3], 0  ;;  %s536_s0 = inlined_call_operand.hbm [shape: f32[8,128], index: 0, kind: input, shape index: {}]   ;;  %s537_s1 = inlined_call_operand.hbm [shape: f32[8,128], index: 1, kind: input, shape index: {}]   ;;  %s538_s2 = inlined_call_operand.hbm [shape: f32[128,256], index: 2, kind: input, shape index: {}]   ;;  %s539_s3 = inlined_call_operand.vmem [shape: f32[1,256], index: 3, kind: input, shape index: {}]   ;;  %s540_s4 = inlined_call_operand.hbm [shape: f32[8,128], index: 4, kind: output, shape index: {0}]   ;;  %s541_s5 = inlined_call_operand.hbm [shape: f32[8,128], index: 5, kind: output, shape index: {1}]   ;;  %s542_s6 = inlined_call_operand.hbm [shape: f32[8,128], index: 6, kind: output, shape index: {2}]  }
   0x1   :  { %13 = vsyncpa [#allocation6], 0 }
   0x2   :  { %14 = vsyncpa [#allocation4], 0 }
   0x3   :  { %15 = vsyncpa [#allocation10], 0  ;;  %s410_s21 = smov [#allocation5]   ;;  %s411_s23 = smov [#allocation2]  }
   0x4   :  { %s32_s22 = sshll.u32 %s410_s21, 4  ;;  %s22_s24 = sshll.u32 %s411_s23, 4  ;;  %s33_s22 = int_to_ptr.vmem [resolvable:$true] %s32_s22  ;;  %s23_s24 = int_to_ptr.vmem [resolvable:$true] %s22_s24 }
   0x5   :  { %s270_s27 = scalar_lea.hbm %s537_s1, 128 }
   0x6   :  { %p271_p0 = scmp.ne.s32.totalorder %s537_s1, %s270_s27  ;;  %p274_p1 = scmp.lt.u32.totalorder %s270_s27, %s537_s1 }
   0x8   :  { %p276_p2 = pnand %p274_p1, %p271_p0 }
   0xa   :  { %279 = shalt.err (!%p276_p2)
}
   0xb   :  { %s280_s8 = scalar_lea.vmem %s33_s22, 128  ;;  %p285_p4 = scmp.lt.s32.totalorder %s33_s22, %s33_s22 }
   0xc   :  { %p281_p3 = scmp.ne.s32.totalorder %s33_s22, %s280_s8  ;;  %p286_p5 = scmp.lt.s32.totalorder %s280_s8, %s280_s8 }
   0xe   :  { %p287_p6 = por %p286_p5, %p285_p4 }
  0x10   :  { %p288_p7 = pnand %p287_p6, %p281_p3 }
  0x12   :  { %291 = shalt.err (!%p288_p7)
}
  0x13   :  { %35 = dma.hbm_to_vmem [thread:$0]  %s537_s1, 128, %s33_s22, [#allocation6]  }
  0x14   :  { %s292_s13 = scalar_lea.hbm %s536_s0, 128 }
  0x15   :  { %p293_p8 = scmp.ne.s32.totalorder %s536_s0, %s292_s13  ;;  %p296_p9 = scmp.lt.u32.totalorder %s292_s13, %s536_s0 }
  0x17   :  { %p298_p10 = pnand %p296_p9, %p293_p8 }
  0x19   :  { %301 = shalt.err (!%p298_p10)
}
  0x1a   :  { %s302_s18 = scalar_lea.vmem %s23_s24, 128  ;;  %p307_p12 = scmp.lt.s32.totalorder %s23_s24, %s23_s24 }
  0x1b   :  { %p303_p11 = scmp.ne.s32.totalorder %s23_s24, %s302_s18  ;;  %p308_p13 = scmp.lt.s32.totalorder %s302_s18, %s302_s18 }
  0x1d   :  { %p309_p0 = por %p308_p13, %p307_p12 }
  0x1f   :  { %p310_p1 = pnand %p309_p0, %p303_p11 }
  0x21   :  { %313 = shalt.err (!%p310_p1)
}
  0x22   :  { %25 = dma.hbm_to_vmem [thread:$0]  %s536_s0, 128, %s23_s24, [#allocation3]  }
  0x23   :  { %s412_s20 = smov [#allocation7]   ;;  %s314_s25 = scalar_lea.hbm %s538_s2, 4096 }
  0x24   :  { %s41_s21 = sshll.u32 %s412_s20, 4  ;;  %p315_p2 = scmp.ne.s32.totalorder %s538_s2, %s314_s25  ;;  %s42_s21 = int_to_ptr.vmem [resolvable:$true] %s41_s21 }
  0x25   :  { %p318_p3 = scmp.lt.u32.totalorder %s314_s25, %s538_s2 }
  0x27   :  { %p320_p4 = pnand %p318_p3, %p315_p2 }
  0x29   :  { %323 = shalt.err (!%p320_p4)
}
  0x2a   :  { %s324_s30 = scalar_lea.vmem %s42_s21, 4096  ;;  %p329_p6 = scmp.lt.s32.totalorder %s42_s21, %s42_s21 }
  0x2b   :  { %p325_p5 = scmp.ne.s32.totalorder %s42_s21, %s324_s30  ;;  %p330_p7 = scmp.lt.s32.totalorder %s324_s30, %s324_s30 }
  0x2d   :  { %p331_p8 = por %p330_p7, %p329_p6 }
  0x2f   :  { %p332_p9 = pnand %p331_p8, %p325_p5 }
  0x31   :  { %335 = shalt.err (!%p332_p9)
}
  0x32   :  { %s413_s0 = smov 256   ;;  %s414_s24 = smov 16  }
  0x33   :  { %47 = dma.hbm_to_vmem [thread:$0]  %s538_s2, 4096, %s42_s21, [#allocation6], %s413_s0, %s413_s0, %s414_s24  }
  0x34   :  { %402 = dma.done.wait [#allocation3], 128  }
  0x35   :  { %403 = vsyncadd [#allocation3], 4294967168 }
  0x36   :  { %404 = dma.done.wait [#allocation6], 4224  }
  0x37   :  { %405 = vsyncadd [#allocation6], 4294963072  ;;  %v415_v0 = vmov 0.0   ;;  %v61_v1 = vld [vmem:[#allocation7 + $0x8] sm:$0xff]  ;;  %v63_v2 = vld [vmem:[#allocation7 + $0x18] sm:$0xff]  ;;  %v94_v50 = vlaneseq  ;;  %s416_s10 = smov [#allocation9]  }
  0x38   :  { %168 = vmatprep.mubr.f32.mxu0 %v415_v0  ;;  %v60_v3 = vld [vmem:[#allocation7] sm:$0xff]  ;;  %v227_v4 = vpack.c.bf16 %v63_v2, %v61_v1  ;;  %v62_v5 = vld [vmem:[#allocation7 + $0x10] sm:$0xff]  ;;  %v65_v6 = vld [vmem:[#allocation7 + $0x28] sm:$0xff]  ;;  %s200_s11 = sshll.u32 %s416_s10, 4  ;;  %s417_s12 = smov [#allocation11]   ;;  %s201_s11 = int_to_ptr.vmem [resolvable:$true] %s200_s11 }
  0x39   :  { %v67_v7 = vld [vmem:[#allocation7 + $0x38] sm:$0xff]  ;;  %v229_v8 = vpack.c.bf16 %v62_v5, %v60_v3  ;;  %v64_v10 = vld [vmem:[#allocation7 + $0x20] sm:$0xff]  ;;  %v66_v11 = vld [vmem:[#allocation7 + $0x30] sm:$0xff]  ;;  %v95_v51 = vshrl.u32 %v94_v50, 7  ;;  %s210_s13 = sshll.u32 %s417_s12, 4  ;;  %s336_s14 = scalar_lea.vmem %s201_s11, 128  ;;  %s493_s13 = int_to_ptr.vmem [resolvable:$true] %s210_s13 }
  0x3a   :  { %v231_v9 = vpack.c.bf16 %v67_v7, %v65_v6  ;;  %v69_v12 = vld [vmem:[#allocation7 + $0x48] sm:$0xff]  ;;  %228 = vmatprep.subr.bf16.mxu0 %v227_v4  ;;  %v71_v13 = vld [vmem:[#allocation7 + $0x58] sm:$0xff]  ;;  %v233_v14 = vpack.c.bf16 %v66_v11, %v64_v10  ;;  %v68_v16 = vld [vmem:[#allocation7 + $0x40] sm:$0xff]  ;;  %p337_p10 = scmp.ne.s32.totalorder %s201_s11, %s336_s14  ;;  %p341_p11 = scmp.lt.s32.totalorder %s201_s11, %s201_s11 }
  0x3b   :  { %230 = vmatpush1.bf16.msra.mxu0 %v229_v8  ;;  %v235_v15 = vpack.c.bf16 %v71_v13, %v69_v12  ;;  %v70_v17 = vld [vmem:[#allocation7 + $0x50] sm:$0xff]  ;;  %v73_v18 = vld [vmem:[#allocation7 + $0x68] sm:$0xff]  ;;  %v75_v19 = vld [vmem:[#allocation7 + $0x78] sm:$0xff]  ;;  %v96_v52 = vsub.s32 0, %v95_v51  ;;  %v100_v54 = vsub.s32 1, %v95_v51  ;;  %p342_p12 = scmp.lt.s32.totalorder %s336_s14, %s336_s14 }
  0x3c   :  { %232 = vmatprep.subr.bf16.mxu0 %v231_v9  ;;  %v237_v20 = vpack.c.bf16 %v70_v17, %v68_v16  ;;  %v239_v21 = vpack.c.bf16 %v75_v19, %v73_v18  ;;  %v72_v22 = vld [vmem:[#allocation7 + $0x60] sm:$0xff]  ;;  %v74_v23 = vld [vmem:[#allocation7 + $0x70] sm:$0xff]  ;;  %v77_v24 = vld [vmem:[#allocation7 + $0x88] sm:$0xff] }
  0x3d   :  { %v79_v25 = vld [vmem:[#allocation7 + $0x98] sm:$0xff]  ;;  %v241_v26 = vpack.c.bf16 %v74_v23, %v72_v22  ;;  %v76_v28 = vld [vmem:[#allocation7 + $0x80] sm:$0xff]  ;;  %v78_v29 = vld [vmem:[#allocation7 + $0x90] sm:$0xff]  ;;  %p343_p13 = por %p342_p12, %p341_p11 }
  0x3e   :  { %v243_v27 = vpack.c.bf16 %v79_v25, %v77_v24  ;;  %v81_v30 = vld [vmem:[#allocation7 + $0xa8] sm:$0xff]  ;;  %v83_v31 = vld [vmem:[#allocation7 + $0xb8] sm:$0xff]  ;;  %v245_v32 = vpack.c.bf16 %v78_v29, %v76_v28  ;;  %v80_v34 = vld [vmem:[#allocation7 + $0xa0] sm:$0xff] }
  0x3f   :  { %234 = vmatpush1.bf16.msra.mxu0 %v233_v14  ;;  %v247_v33 = vpack.c.bf16 %v83_v31, %v81_v30  ;;  %v82_v35 = vld [vmem:[#allocation7 + $0xb0] sm:$0xff]  ;;  %v85_v36 = vld [vmem:[#allocation7 + $0xc8] sm:$0xff]  ;;  %v87_v37 = vld [vmem:[#allocation7 + $0xd8] sm:$0xff]  ;;  %p344_p0 = pnand %p343_p13, %p337_p10 }
  0x40   :  { %236 = vmatprep.subr.bf16.mxu0 %v235_v15  ;;  %v249_v38 = vpack.c.bf16 %v82_v35, %v80_v34  ;;  %v251_v39 = vpack.c.bf16 %v87_v37, %v85_v36  ;;  %v84_v40 = vld [vmem:[#allocation7 + $0xc0] sm:$0xff]  ;;  %v86_v41 = vld [vmem:[#allocation7 + $0xd0] sm:$0xff]  ;;  %v89_v42 = vld [vmem:[#allocation7 + $0xe8] sm:$0xff] }
  0x41   :  { %v91_v43 = vld [vmem:[#allocation7 + $0xf8] sm:$0xff]  ;;  %v253_v44 = vpack.c.bf16 %v86_v41, %v84_v40  ;;  %v88_v46 = vld [vmem:[#allocation7 + $0xe0] sm:$0xff]  ;;  %v90_v47 = vld [vmem:[#allocation7 + $0xf0] sm:$0xff] }
  0x42   :  { %v255_v45 = vpack.c.bf16 %v91_v43, %v89_v42  ;;  %v257_v48 = vpack.c.bf16 %v90_v47, %v88_v46  ;;  %v59_v49 = vld [vmem:[#allocation2] sm:$0xff] }
  0x43   :  { %238 = vmatpush1.bf16.msra.mxu0 %v237_v20  ;;  %v92_v53 = vld [vmem:[%s539_s3] sm:$0x3] }
  0x44   :  { %240 = vmatprep.subr.bf16.mxu0 %v239_v21  ;;  %v97_v55 = vrot.slane %v92_v53, %v96_v52  ;;  %v101_v56 = vrot.slane %v92_v53, %v100_v54 }
  0x47   :  { %242 = vmatpush1.bf16.msra.mxu0 %v241_v26 }
  0x48   :  { %244 = vmatprep.subr.bf16.mxu0 %v243_v27 }
  0x4b   :  { %246 = vmatpush1.bf16.msra.mxu0 %v245_v32 }
  0x4c   :  { %248 = vmatprep.subr.bf16.mxu0 %v247_v33 }
  0x4f   :  { %250 = vmatpush1.bf16.msra.mxu0 %v249_v38 }
  0x50   :  { %252 = vmatprep.subr.bf16.mxu0 %v251_v39 }
  0x53   :  { %254 = vmatpush1.bf16.msra.mxu0 %v253_v44 }
  0x54   :  { %256 = vmatprep.subr.bf16.mxu0 %v255_v45 }
  0x57   :  { %258 = vmatpush1.bf16.msra.mxu0 %v257_v48 }
  0x5a   :  { %169 = vmatmul.mubr.f32.vlgmr.msra.gmra.mrb[0].mxu0 %v59_v49 }
 0x12d   :  { %v170_v57 = vpop.f32.mrb[0].mxu0 }
 0x12e   :  { %v171_v58 = vadd.f32 %v170_v57, %v97_v55  ;;  %v172_v59 = vpop.f32.mrb[1].mxu0 }
 0x12f   :  { %v173_v60 = vadd.f32 %v172_v59, %v101_v56 }
 0x130   :  { %182 = vst [vmem:[#allocation9] sm:$0xff] %v171_v58 }
 0x131   :  { %v175_v61 = vmul.f32 0.5, %v173_v60  ;;  %183 = vst [vmem:[#allocation11] sm:$0xff] %v173_v60 }
 0x132   :  { %347 = shalt.err (!%p344_p0)
}
 0x133   :  { %s348_s16 = scalar_lea.hbm %s541_s5, 128 }
 0x134   :  { %p349_p1 = scmp.ne.s32.totalorder %s541_s5, %s348_s16  ;;  %p352_p2 = scmp.lt.u32.totalorder %s348_s16, %s541_s5 }
 0x136   :  { %p354_p3 = pnand %p352_p2, %p349_p1 }
 0x138   :  { %357 = shalt.err (!%p354_p3)
}
 0x139   :  { %203 = dma.vmem_to_hbm [thread:$0]  %s201_s11, 128, %s541_s5, [#allocation10]  }
 0x13a   :  { %s358_s22 = scalar_lea.vmem %s493_s13, 128  ;;  %p363_p5 = scmp.lt.s32.totalorder %s493_s13, %s493_s13 }
 0x13b   :  { %p359_p4 = scmp.ne.s32.totalorder %s493_s13, %s358_s22  ;;  %p364_p6 = scmp.lt.s32.totalorder %s358_s22, %s358_s22 }
 0x13d   :  { %p365_p7 = por %p364_p6, %p363_p5 }
 0x13f   :  { %p366_p8 = pnand %p365_p7, %p359_p4 }
 0x141   :  { %369 = shalt.err (!%p366_p8)
}
 0x142   :  { %s370_s26 = scalar_lea.hbm %s542_s6, 128 }
 0x143   :  { %p371_p9 = scmp.ne.s32.totalorder %s542_s6, %s370_s26  ;;  %p374_p10 = scmp.lt.u32.totalorder %s370_s26, %s542_s6 }
 0x145   :  { %p376_p11 = pnand %p374_p10, %p371_p9 }
 0x147   :  { %379 = shalt.err (!%p376_p11)
}
 0x148   :  { %213 = dma.vmem_to_hbm [thread:$0]  %s493_s13, 128, %s542_s6, [#allocation10]   ;;  %v176_v62 = vmul.f32 1.442695, %v175_v61  ;;  %v178_v63 = vld [vmem:[#allocation5] sm:$0xff] }
 0x149   :  { %s418_s24 = smov [#allocation8]  }
 0x14a   :  { %268 = vpow2.f32 %v176_v62  ;;  %s190_s7 = sshll.u32 %s418_s24, 4  ;;  %s191_s7 = int_to_ptr.vmem [resolvable:$true] %s190_s7 }
 0x14b   :  { %s380_s8 = scalar_lea.vmem %s191_s7, 128  ;;  %p385_p13 = scmp.lt.s32.totalorder %s191_s7, %s191_s7 }
 0x14c   :  { %p381_p12 = scmp.ne.s32.totalorder %s191_s7, %s380_s8  ;;  %p386_p0 = scmp.lt.s32.totalorder %s380_s8, %s380_s8 }
 0x14e   :  { %p387_p1 = por %p386_p0, %p385_p13 }
 0x150   :  { %p388_p2 = pnand %p387_p1, %p381_p12 }
 0x154   :  { %v269_v0 = vpop.eup %268 }
 0x155   :  { %v179_v1 = vmul.f32 %v269_v0, %v178_v63 }
 0x157   :  { %v180_v2 = vadd.f32 %v179_v1, %v171_v58 }
 0x159   :  { %181 = vst [vmem:[#allocation8] sm:$0xff] %v180_v2 }
 0x15a   :  { %391 = shalt.err (!%p388_p2)
}
 0x15b   :  { %s392_s6 = scalar_lea.hbm %s540_s4, 128 }
 0x15c   :  { %p393_p3 = scmp.ne.s32.totalorder %s540_s4, %s392_s6  ;;  %p396_p4 = scmp.lt.u32.totalorder %s392_s6, %s540_s4 }
 0x15e   :  { %p398_p5 = pnand %p396_p4, %p393_p3 }
 0x160   :  { %401 = shalt.err (!%p398_p5)
}
 0x161   :  { %193 = dma.vmem_to_hbm [thread:$0]  %s191_s7, 128, %s540_s4, [#allocation4]  }
 0x162   :  { %406 = dma.done.wait [#allocation4], 128  }
 0x163   :  { %407 = vsyncadd [#allocation4], 4294967168 }
 0x164   :  { %408 = dma.done.wait [#allocation10], 256  }
 0x165   :  { %409 = vsyncadd [#allocation10], 4294967040 }
 0x166   :  { %223 = vsyncpa [#allocation3], 1 }
 0x167   :  { %224 = vsyncpa [#allocation6], 1 }
 0x168   :  { %225 = vsyncpa [#allocation4], 1 }
 0x169   :  { %226 = vsyncpa [#allocation10], 1 }

</bundles_post_ra>
